<compile_context>
chip_gen: v5e
topology: v5e:2x2
jax: 0.10.0
libtpu: 0.0.40
codegen_flags: <defaults>
</compile_context>

<pallas_src>
import jax
import jax.numpy as jnp
from jax.experimental import pallas as pl
from jax.experimental.pallas import tpu as pltpu

F_IN = 11        # input features
H = 16           # hidden units
P = 8            # batch rows packed per sublane-row (8*11 = 88 <= 128 lanes)
_ALIGN = 16      # row-group alignment for block shapes (safe for f32 and bf16)
_INNER_MAX = 512  # row-groups (= 4096 batch rows) per inner compute chunk


def _cdiv(a, b):
    return -(-a // b)


def _round_up(a, b):
    return _cdiv(a, b) * b


def _make_kernel(inner, n_inner, precision):
    def kernel(xg_ref, w1_ref, b1_ref, w2_ref, b2_ref, o_ref):
        # xg_ref: (tbg, 88)   8 batch rows packed per sublane-row
        # w1_ref: (88, 128)   block-diagonal fc1 weights (8 copies of w1.T)
        # b1_ref: (1, 128)    fc1 bias tiled 8x
        # w2_ref: (128, 8)    block-diagonal fc2 weights, pre-scaled by 0.5
        # b2_ref: (1,) SMEM   0.5 * fc2 bias
        # o_ref:  (tbg, 8)
        w1 = w1_ref[...]
        b1 = b1_ref[...]
        w2 = w2_ref[...]
        hb2 = b2_ref[0]

        def chunk(start):
            xs = xg_ref[pl.ds(start, inner), :]
            h = jnp.dot(xs, w1, preferred_element_type=jnp.float32,
                        precision=precision)
            h = jnp.maximum(h + b1, 0.0)                       # fc1 bias + ReLU
            # fc2 (weights/bias pre-scaled by 0.5); sigmoid(z) = 0.5*tanh(z/2)+0.5
            t = jnp.dot(h, w2, preferred_element_type=jnp.float32,
                        precision=precision) + hb2
            o_ref[pl.ds(start, inner), :] = (
                jnp.tanh(t) * 0.5 + 0.5).astype(o_ref.dtype)

        if n_inner == 1:
            chunk(0)
        else:
            def body(c, carry):
                chunk(pl.multiple_of(c * inner, inner))
                return carry
            jax.lax.fori_loop(0, n_inner, body, 0)

    return kernel


def net_forward(x, w1, b1, w2, b2, *, block_rows=65536, precision=None):
    """Forward pass of Net.  x: (B, 11) -> (B, 1) float32.

    Params in PyTorch nn.Linear layout: w1 (16,11), b1 (16,), w2 (1,16), b2 (1,).
    `block_rows`: batch rows per grid step (tile size); `precision`: matmul
    precision for the in-kernel dots (None = platform default / fast path).
    """
    B, f = x.shape
    assert f == F_IN and w1.shape == (H, F_IN) and w2.shape == (1, H)

    # Pad the batch to a multiple of P=8 only when needed (padding copies x).
    b_pad = _round_up(B, P)
    if b_pad != B:
        x = jnp.pad(x, ((0, b_pad - B), (0, 0)))
    G = b_pad // P
    # Zero-copy bitcast reshape: 8 consecutive batch rows per packed row.
    xg = x.reshape(G, P * F_IN)

    # ---- Tile-size selection (in row-groups of 8 batch rows). ----
    cap = max(_ALIGN, _round_up(min(block_rows // P, 1 << 17), _ALIGN))
    inner = min(_INNER_MAX, cap)
    if G <= inner:
        tbg = _round_up(G, _ALIGN)
        inner = tbg
        n_inner = 1
    else:
        cap = max(inner, (cap // inner) * inner)
        steps = _cdiv(G, cap)
        if steps == 1 and G > 2 * inner:
            steps = 2            # >= 2 grid steps so both v7x TensorCores work
        tbg = _round_up(_cdiv(G, steps), inner)
        n_inner = tbg // inner
    grid = (_cdiv(G, tbg),)

    # ---- Packed block-diagonal weights (tiny; built once per trace). ----
    f32 = jnp.float32
    w1t = w1.astype(f32).T                                   # (11, 16)
    w1b = jnp.zeros((P * F_IN, P * H), f32)
    w2b = jnp.zeros((P * H, P), f32)
    for j in range(P):
        w1b = w1b.at[j * F_IN:(j + 1) * F_IN, j * H:(j + 1) * H].set(w1t)
        w2b = w2b.at[j * H:(j + 1) * H, j].set(w2.astype(f32).reshape(H))
    w2b = w2b * 0.5                                          # fold sigmoid's z/2
    b1b = jnp.tile(b1.astype(f32), P).reshape(1, P * H)       # (1, 128)
    b2h = (0.5 * b2.astype(f32)).reshape(1)                   # SMEM scalar

    if x.dtype != f32:
        # Producer already emits a narrow dtype (e.g. bf16): run fc1 natively
        # in that dtype (f32 accumulation).  Biases / fc2 weights stay f32.
        # x itself is never cast in the wrapper (would add a full HBM pass).
        w1b = w1b.astype(x.dtype)

    out = pl.pallas_call(
        _make_kernel(inner, n_inner, precision),
        out_shape=jax.ShapeDtypeStruct((G, P), jnp.float32),
        grid=grid,
        in_specs=[
            pl.BlockSpec((tbg, P * F_IN), lambda i: (i, 0)),    # x tile (pipelined)
            pl.BlockSpec((P * F_IN, P * H), lambda i: (0, 0)),  # weights: resident
            pl.BlockSpec((1, P * H), lambda i: (0, 0)),
            pl.BlockSpec((P * H, P), lambda i: (0, 0)),
            pl.BlockSpec(memory_space=pltpu.MemorySpace.SMEM),  # b2 scalar
        ],
        out_specs=pl.BlockSpec((tbg, P), lambda i: (i, 0)),
        compiler_params=pltpu.CompilerParams(
            dimension_semantics=("parallel",),
            vmem_limit_bytes=48 * 1024 * 1024,
        ),
    )(xg, w1b, b1b, w2b, b2h)

    # (G, 8) -> (B, 1): contiguous, so the reshape is a free bitcast.
    return out.reshape(b_pad, 1)[:B]


def init_params(key):
    """Deterministic init mirroring nn.Linear (PyTorch layout)."""
    k1, k2, k3, k4 = jax.random.split(key, 4)
    bound1 = 1.0 / jnp.sqrt(11.0)
    w1 = jax.random.uniform(k1, (16, 11), jnp.float32, -bound1, bound1)
    b1 = jax.random.uniform(k2, (16,), jnp.float32, -bound1, bound1)
    bound2 = 1.0 / jnp.sqrt(16.0)
    w2 = jax.random.uniform(k3, (1, 16), jnp.float32, -bound2, bound2)
    b2 = jax.random.uniform(k4, (1,), jnp.float32, -bound2, bound2)
    return w1, b1, w2, b2


if __name__ == "__main__":
    key = jax.random.PRNGKey(0)
    k_params, k_x = jax.random.split(key)
    w1, b1, w2, b2 = init_params(k_params)

    def ref_fn(xx, precision=None):
        h = jnp.maximum(jnp.dot(xx, w1.T, precision=precision) + b1, 0.0)
        return jax.nn.sigmoid(jnp.dot(h, w2.T, precision=precision) + b2)

    hp = jax.lax.Precision.HIGHEST

    # 1) Small batch; exact-precision check (HIGHEST in kernel and reference).
    x_small = jax.random.normal(k_x, (8, 11), dtype=jnp.float32)
    out_small = net_forward(x_small, w1, b1, w2, b2, precision=hp)
    jax.block_until_ready(out_small)
    assert out_small.shape == (8, 1)
    assert jnp.allclose(out_small, ref_fn(x_small, hp), atol=1e-5, rtol=1e-5)

    # 2) Batch not a multiple of 8: pad path + partial edge block.
    x_mid = jax.random.normal(jax.random.PRNGKey(1), (300, 11), dtype=jnp.float32)
    out_mid = net_forward(x_mid, w1, b1, w2, b2, precision=hp)
    jax.block_until_ready(out_mid)
    assert out_mid.shape == (300, 1)
    assert jnp.allclose(out_mid, ref_fn(x_mid, hp), atol=1e-5, rtol=1e-5)

    # 3) Multi-step grid and multi-chunk inner loop (default fast precision;
    #    loose tolerance covers any MXU default-precision difference vs XLA).
    x_big = jax.random.normal(jax.random.PRNGKey(2), (6000, 11), dtype=jnp.float32)
    out_a = net_forward(x_big, w1, b1, w2, b2, block_rows=2048)    # 3 grid steps
    out_b = net_forward(x_big, w1, b1, w2, b2, block_rows=16384)   # 1 step, 2 chunks
    jax.block_until_ready((out_a, out_b))
    ref_big = ref_fn(x_big)
    assert jnp.allclose(out_a, ref_big, atol=5e-3, rtol=0)
    assert jnp.allclose(out_b, ref_big, atol=5e-3, rtol=0)

    # 4) bf16 input produced upstream (no wrapper cast): halves x HBM traffic.
    x_bf16 = x_small.astype(jnp.bfloat16)
    out_bf16 = net_forward(x_bf16, w1, b1, w2, b2)
    jax.block_until_ready(out_bf16)
    assert jnp.allclose(out_bf16, ref_fn(x_small), atol=2e-2, rtol=2e-2)

    print("KERNEL_OK")
</pallas_src>

<mosaic_0001>
module attributes {stable_mosaic.version = 11 : i64} {
  func.func @kernel(%arg0: i32, %arg1: memref<16x88xf32, #tpu.memory_space<vmem>>, %arg2: memref<88x128xf32, #tpu.memory_space<vmem>>, %arg3: memref<1x128xf32, #tpu.memory_space<vmem>>, %arg4: memref<128x8xf32, #tpu.memory_space<vmem>>, %arg5: memref<1xf32, #tpu.memory_space<smem>>, %arg6: memref<16x8xf32, #tpu.memory_space<vmem>>) attributes {dimension_semantics = [#tpu.dimension_semantics<parallel>], iteration_bounds = array<i64: 1>, scalar_prefetch = 0 : i64, scratch_operands = 0 : i64, tpu.core_type = #tpu.core_type<tc>, window_params = [{transform_indices = @transform_0, window_bounds = array<i64: 16, 88>}, {pipeline_mode = #tpu.pipeline_mode<synchronous>, transform_indices = @transform_1, window_bounds = array<i64: 88, 128>}, {pipeline_mode = #tpu.pipeline_mode<synchronous>, transform_indices = @transform_2, window_bounds = array<i64: 1, 128>}, {pipeline_mode = #tpu.pipeline_mode<synchronous>, transform_indices = @transform_3, window_bounds = array<i64: 128, 8>}, {transform_indices = @transform_4, window_bounds = array<i64: 1>}, {transform_indices = @transform_5, window_bounds = array<i64: 16, 8>}]} {
    %c0 = arith.constant 0 : index
    %c0_0 = arith.constant 0 : index
    %0 = vector.load %arg2[%c0, %c0_0] : memref<88x128xf32, #tpu.memory_space<vmem>>, vector<88x128xf32>
    %c0_1 = arith.constant 0 : index
    %c0_2 = arith.constant 0 : index
    %1 = vector.load %arg3[%c0_1, %c0_2] : memref<1x128xf32, #tpu.memory_space<vmem>>, vector<1x128xf32>
    %c0_3 = arith.constant 0 : index
    %c0_4 = arith.constant 0 : index
    %2 = vector.load %arg4[%c0_3, %c0_4] : memref<128x8xf32, #tpu.memory_space<vmem>>, vector<128x8xf32>
    %c0_5 = arith.constant 0 : index
    %3 = memref.load %arg5[%c0_5] : memref<1xf32, #tpu.memory_space<smem>>
    %c0_6 = arith.constant 0 : index
    %c0_7 = arith.constant 0 : index
    %4 = vector.load %arg1[%c0_6, %c0_7] : memref<16x88xf32, #tpu.memory_space<vmem>>, vector<16x88xf32>
    %cst = arith.constant dense<0.000000e+00> : vector<16x128xf32>
    %5 = tpu.matmul %4, %0, %cst {dimension_numbers = #tpu.dot_dimension_numbers<[1], [0], [0], [1], [0, 0, 1, 1], [], []>, precision = #tpu.contract_precision<fp32>} : vector<16x88xf32>, vector<88x128xf32>, vector<16x128xf32> -> vector<16x128xf32>
    %6 = vector.broadcast %1 : vector<1x128xf32> to vector<16x128xf32>
    %7 = arith.addf %5, %6 : vector<16x128xf32>
    %cst_8 = arith.constant 0.000000e+00 : f32
    %8 = vector.broadcast %cst_8 : f32 to vector<16x128xf32>
    %9 = arith.maximumf %7, %8 : vector<16x128xf32>
    %cst_9 = arith.constant dense<0.000000e+00> : vector<16x8xf32>
    %10 = tpu.matmul %9, %2, %cst_9 {dimension_numbers = #tpu.dot_dimension_numbers<[1], [0], [0], [1], [0, 0, 1, 1], [], []>, precision = #tpu.contract_precision<fp32>} : vector<16x128xf32>, vector<128x8xf32>, vector<16x8xf32> -> vector<16x8xf32>
    %11 = vector.broadcast %3 : f32 to vector<16x8xf32>
    %12 = arith.addf %10, %11 : vector<16x8xf32>
    %13 = math.tanh %12 : vector<16x8xf32>
    %cst_10 = arith.constant 5.000000e-01 : f32
    %14 = vector.broadcast %cst_10 : f32 to vector<16x8xf32>
    %15 = arith.mulf %13, %14 : vector<16x8xf32>
    %cst_11 = arith.constant 5.000000e-01 : f32
    %16 = vector.broadcast %cst_11 : f32 to vector<16x8xf32>
    %17 = arith.addf %15, %16 : vector<16x8xf32>
    %c0_12 = arith.constant 0 : index
    %c0_13 = arith.constant 0 : index
    %18 = vector.load %arg6[%c0_12, %c0_13] : memref<16x8xf32, #tpu.memory_space<vmem>>, vector<16x8xf32>
    tpu.vector_store %arg6[%c0_12, %c0_13], %17 {strides = array<i32>} : memref<16x8xf32, #tpu.memory_space<vmem>>, vector<16x8xf32>,
    return
  }
  func.func @transform_0(%arg0: i32) -> (i32, i32) {
    %c0_i32 = arith.constant 0 : i32
    %c0_i32_0 = arith.constant 0 : i32
    return %arg0, %c0_i32 : i32, i32
  }
  func.func @transform_1(%arg0: i32) -> (i32, i32) {
    %c0_i32 = arith.constant 0 : i32
    %c0_i32_0 = arith.constant 0 : i32
    %c0_i32_1 = arith.constant 0 : i32
    return %c0_i32, %c0_i32_0 : i32, i32
  }
  func.func @transform_2(%arg0: i32) -> (i32, i32) {
    %c0_i32 = arith.constant 0 : i32
    %c0_i32_0 = arith.constant 0 : i32
    %c0_i32_1 = arith.constant 0 : i32
    return %c0_i32, %c0_i32_0 : i32, i32
  }
  func.func @transform_3(%arg0: i32) -> (i32, i32) {
    %c0_i32 = arith.constant 0 : i32
    %c0_i32_0 = arith.constant 0 : i32
    %c0_i32_1 = arith.constant 0 : i32
    return %c0_i32, %c0_i32_0 : i32, i32
  }
  func.func @transform_4(%arg0: i32) -> i32 {
    %c0_i32 = arith.constant 0 : i32
    %c0_i32_0 = arith.constant 0 : i32
    return %c0_i32 : i32
  }
  func.func @transform_5(%arg0: i32) -> (i32, i32) {
    %c0_i32 = arith.constant 0 : i32
    %c0_i32_0 = arith.constant 0 : i32
    return %arg0, %c0_i32 : i32, i32
  }
}

</mosaic_0001>

<bundles_post_ra>
// kernel: tpu_custom_call.1
= control target key start
LH: loop header
LB: loop body
LE: loop exit
PB: predicated region body
PF: predicated region fallthrough
CT: control target
= control target key end

     0   :  { %11 = vsyncpa [#allocation4], 0  ;;  %vm56_vm0 = vcmask 719872   ;;  %vm751_vm1 = vcmask 64512   ;;  %s1328_s0 = inlined_call_operand.vmem [shape: f32[1,88], index: 0, kind: input, shape index: {}]   ;;  %s1329_s1 = inlined_call_operand.vmem [shape: f32[88,128], index: 1, kind: input, shape index: {}]   ;;  %s1330_s2 = inlined_call_operand.vmem [shape: f32[1,128], index: 2, kind: input, shape index: {}]   ;;  %s1331_s3 = inlined_call_operand.vmem [shape: f32[128,8], index: 3, kind: input, shape index: {}]   ;;  %s1332_s4 = inlined_call_operand.<no memory space> [shape: f32[1], index: 4, kind: input, shape index: {}]   ;;  %s1333_s5 = inlined_call_operand.hbm [shape: f32[1,8], index: 5, kind: output, shape index: {}]  }
   0x1   :  { %v32_v0 = vld [vmem:[%s1329_s1 + $0x50] sm:$0xff]  ;;  %v31_v1 = vld [vmem:[%s1329_s1 + $0x48] sm:$0xff]  ;;  %v30_v4 = vld [vmem:[%s1329_s1 + $0x40] sm:$0xff] }
   0x2   :  { %v845_v2 = vand.u32 4294901760, %v32_v0  ;;  %v847_v3 = vand.u32 4294901760, %v31_v1  ;;  %v29_v5 = vld [vmem:[%s1329_s1 + $0x38] sm:$0xff]  ;;  %v28_v6 = vld [vmem:[%s1329_s1 + $0x30] sm:$0xff]  ;;  %v858_v7 = vand.u32 4294901760, %v30_v4  ;;  %v27_v10 = vld [vmem:[%s1329_s1 + $0x28] sm:$0xff] }
   0x3   :  { %v860_v8 = vand.u32 4294901760, %v29_v5  ;;  %v862_v9 = vand.u32 4294901760, %v28_v6  ;;  %v26_v11 = vld [vmem:[%s1329_s1 + $0x20] sm:$0xff]  ;;  %v25_v12 = vld [vmem:[%s1329_s1 + $0x18] sm:$0xff]  ;;  %v877_v14 = vand.u32 4294901760, %v27_v10  ;;  %v24_v17 = vld [vmem:[%s1329_s1 + $0x10] sm:$0xff] }
   0x4   :  { %69 = vmatpush.msra.mxu0 %v845_v2  ;;  %v875_v13 = vsub.f32 %v32_v0, %v845_v2  ;;  %v880_v15 = vsub.f32 %v31_v1, %v847_v3  ;;  %242 = vmatpush.msra.mxu3 %v845_v2  ;;  %v883_v16 = vand.u32 4294901760, %v26_v11  ;;  %v889_v18 = vsub.f32 %v30_v4, %v858_v7  ;;  %v23_v24 = vld [vmem:[%s1329_s1 + $0x8] sm:$0xff]  ;;  %v22_v32 = vld [vmem:[%s1329_s1] sm:$0xff] }
   0x5   :  { %v892_v19 = vsub.f32 %v29_v5, %v860_v8  ;;  %v898_v22 = vand.u32 4294901760, %v25_v12  ;;  %v901_v23 = vsub.f32 %v28_v6, %v862_v9  ;;  %v909_v27 = vand.u32 4294901760, %v24_v17  ;;  %v51_v37 = vld [vmem:[%s1328_s0] sm:$0xff]  ;;  %v52_v44 = vld [vmem:[%s1328_s0 + $0x8] sm:$0xff] }
   0x6   :  { %71 = vmatpush.msra.mxu0 %v847_v3  ;;  %v114_v20 = vand.u32 4294901760, %v875_v13  ;;  %194 = vmatpush.msra.mxu2 %v875_v13  ;;  %v120_v21 = vand.u32 4294901760, %v880_v15  ;;  %v126_v25 = vand.u32 4294901760, %v889_v18  ;;  %v912_v28 = vsub.f32 %v27_v10, %v877_v14 }
   0x7   :  { %244 = vmatpush.msra.mxu3 %v847_v3  ;;  %v132_v26 = vand.u32 4294901760, %v892_v19  ;;  %v138_v31 = vand.u32 4294901760, %v901_v23  ;;  %v927_v33 = vsub.f32 %v26_v11, %v883_v16  ;;  %v936_v36 = vand.u32 4294901760, %v23_v24 }
   0x8   :  { %73 = vmatpush.msra.mxu0 %v858_v7  ;;  %v115_v29 = vsub.f32 %v875_v13, %v114_v20  ;;  %v121_v30 = vsub.f32 %v880_v15, %v120_v21  ;;  %197 = vmatpush.msra.mxu2 %v880_v15  ;;  %v127_v34 = vsub.f32 %v889_v18, %v126_v25  ;;  %v144_v40 = vand.u32 4294901760, %v912_v28  ;;  %v48_v15 = vld [vmem:[%s1331_s3 + $0x70] sm:$0xff] }
   0x9   :  { %v133_v35 = vsub.f32 %v892_v19, %v132_v26  ;;  %246 = vmatpush.msra.mxu3 %v858_v7  ;;  %v945_v41 = vsub.f32 %v25_v12, %v898_v22  ;;  %v139_v42 = vsub.f32 %v901_v23, %v138_v31  ;;  %v951_v43 = vand.u32 4294901760, %v22_v32 }
   0xa   :  { %75 = vmatpush.msra.mxu0 %v860_v8  ;;  %v116_v38 = vand.u32 4294901760, %v115_v29  ;;  %v122_v39 = vand.u32 4294901760, %v121_v30  ;;  %200 = vmatpush.msra.mxu2 %v889_v18  ;;  %v128_v45 = vand.u32 4294901760, %v127_v34  ;;  %v150_v46 = vand.u32 4294901760, %v927_v33 }
   0xb   :  { %248 = vmatpush.msra.mxu3 %v860_v8  ;;  %v959_v47 = vsub.f32 %v24_v17, %v909_v27  ;;  %v58_v48 = vsel %vm56_vm0, %v51_v37, 0  ;;  %v134_v49 = vand.u32 4294901760, %v133_v35  ;;  %v145_v51 = vsub.f32 %v912_v28, %v144_v40 }
   0xc   :  { %77 = vmatpush.msra.mxu0 %v862_v9  ;;  %117 = vmatpush.msra.mxu1 %v116_v38  ;;  %v964_v50 = vand.u32 4294901760, %v58_v48  ;;  %v156_v52 = vand.u32 4294901760, %v945_v41  ;;  %v972_v53 = vsub.f32 %v23_v24, %v936_v36  ;;  %v61_v54 = vsel %vm56_vm0, %v52_v44, 0  ;;  %v46_v38 = vld [vmem:[%s1331_s3 + $0x60] sm:$0xff] }
   0xd   :  { %203 = vmatpush.msra.mxu2 %v892_v19  ;;  %250 = vmatpush.msra.mxu3 %v862_v9  ;;  %v978_v56 = vand.u32 4294901760, %v61_v54  ;;  %v140_v57 = vand.u32 4294901760, %v139_v42  ;;  %v151_v58 = vsub.f32 %v927_v33, %v150_v46  ;;  %v162_v59 = vand.u32 4294901760, %v959_v47  ;;  %v44_v42 = vld [vmem:[%s1331_s3 + $0x50] sm:$0xff] }
   0xe   :  { %79 = vmatpush.msra.mxu0 %v877_v14  ;;  %123 = vmatpush.msra.mxu1 %v122_v39  ;;  %v91_v55 = vsub.f32 %v58_v48, %v964_v50  ;;  %v986_v60 = vsub.f32 %v22_v32, %v951_v43  ;;  %v146_v62 = vand.u32 4294901760, %v145_v51  ;;  %v157_v63 = vsub.f32 %v945_v41, %v156_v52  ;;  %v45_v39 = vld [vmem:[%s1331_s3 + $0x58] sm:$0xff] }
   0xf   :  { %206 = vmatpush.msra.mxu2 %v901_v23  ;;  %252 = vmatpush.msra.mxu3 %v877_v14  ;;  %v168_v0 = vand.u32 4294901760, %v972_v53  ;;  %v996_v1 = vsub.f32 %v61_v54, %v978_v56  ;;  %v152_v5 = vand.u32 4294901760, %v151_v58  ;;  %v163_v6 = vsub.f32 %v959_v47, %v162_v59 }
  0x10   :  { %81 = vmatpush.msra.mxu0 %v883_v16  ;;  %129 = vmatpush.msra.mxu1 %v128_v45  ;;  %v92_v61 = vand.u32 4294901760, %v91_v55  ;;  %v174_v10 = vand.u32 4294901760, %v986_v60  ;;  %v158_v11 = vand.u32 4294901760, %v157_v63  ;;  %v1054_v19 = vand.u32 4294901760, %v46_v38  ;;  %v43_v45 = vld [vmem:[%s1331_s3 + $0x48] sm:$0xff] }
  0x11   :  { %209 = vmatpush.msra.mxu2 %v912_v28  ;;  %254 = vmatpush.msra.mxu3 %v883_v16  ;;  %v169_v17 = vsub.f32 %v972_v53, %v168_v0  ;;  %v100_v24 = vand.u32 4294901760, %v996_v1  ;;  %v164_v29 = vand.u32 4294901760, %v163_v6  ;;  %v1058_v44 = vand.u32 4294901760, %v44_v42 }
  0x12   :  { %83 = vmatpush.msra.mxu0 %v898_v22  ;;  %135 = vmatpush.msra.mxu1 %v134_v49  ;;  %v93_v4 = vsub.f32 %v91_v55, %v92_v61  ;;  %v175_v30 = vsub.f32 %v986_v60, %v174_v10  ;;  %v1077_v54 = vsub.f32 %v46_v38, %v1054_v19  ;;  %v1091_v58 = vand.u32 4294901760, %v43_v45 }
  0x13   :  { %212 = vmatpush.msra.mxu2 %v927_v33  ;;  %256 = vmatpush.msra.mxu3 %v898_v22  ;;  %v170_v32 = vand.u32 4294901760, %v169_v17  ;;  %v101_v34 = vsub.f32 %v996_v1, %v100_v24 }
  0x14   :  { %85 = vmatpush.msra.mxu0 %v909_v27  ;;  %141 = vmatpush.msra.mxu1 %v140_v57  ;;  %v94_v12 = vand.u32 4294901760, %v93_v4  ;;  %v176_v35 = vand.u32 4294901760, %v175_v30 }
  0x15   :  { %215 = vmatpush.msra.mxu2 %v945_v41  ;;  %258 = vmatpush.msra.mxu3 %v909_v27  ;;  %v102_v13 = vand.u32 4294901760, %v101_v34 }
  0x16   :  { %87 = vmatpush.msra.mxu0 %v936_v36  ;;  %147 = vmatpush.msra.mxu1 %v146_v62  ;;  %v1096_v62 = vsub.f32 %v44_v42, %v1058_v44 }
  0x17   :  { %218 = vmatpush.msra.mxu2 %v959_v47  ;;  %260 = vmatpush.msra.mxu3 %v936_v36 }
  0x18   :  { %89 = vmatpush.msra.mxu0 %v951_v43  ;;  %153 = vmatpush.msra.mxu1 %v152_v5  ;;  %v454_v5 = vand.u32 4294901760, %v1096_v62 }
  0x19   :  { %221 = vmatpush.msra.mxu2 %v972_v53  ;;  %95 = vmatmul.f32.vlgmr.msra.gmra.mxu0 %v94_v12 }
  0x1a   :  { %284 = vmatpush.msrb.mxu0 %v114_v20  ;;  %159 = vmatpush.msra.mxu1 %v158_v11  ;;  %v49_v20 = vld [vmem:[%s1331_s3 + $0x78] sm:$0xff] }
  0x1b   :  { %224 = vmatpush.msra.mxu2 %v986_v60  ;;  %262 = vmatpush.msra.mxu3 %v951_v43  ;;  %v1039_v18 = vand.u32 4294901760, %v49_v20 }
  0x1c   :  { %288 = vmatpush.msrb.mxu0 %v120_v21  ;;  %165 = vmatpush.msra.mxu1 %v164_v29  ;;  %v47_v21 = vld [vmem:[%s1331_s3 + $0x68] sm:$0xff] }
  0x1d   :  { %227 = vmatmul.f32.vlgmr.msra.gmra.mxu2 %v91_v55  ;;  %266 = vmatmul.f32.vlgmr.msra.gmra.mxu3 %v92_v61  ;;  %v1043_v37 = vand.u32 4294901760, %v47_v21  ;;  %v1067_v48 = vsub.f32 %v49_v20, %v1039_v18  ;;  %v442_v61 = vand.u32 4294901760, %v1077_v54 }
  0x1e   :  { %292 = vmatpush.msrb.mxu0 %v126_v25  ;;  %171 = vmatpush.msra.mxu1 %v170_v32  ;;  %v1041_v25 = vand.u32 4294901760, %v48_v15 }
  0x1f   :  { %v1073_v51 = vsub.f32 %v47_v21, %v1043_v37  ;;  %374 = vmatpush.msrb.mxu2 %v1039_v18  ;;  %v443_v4 = vsub.f32 %v1077_v54, %v442_v61 }
  0x20   :  { %296 = vmatpush.msrb.mxu0 %v132_v26  ;;  %177 = vmatpush.msra.mxu1 %v176_v35  ;;  %v1056_v26 = vand.u32 4294901760, %v45_v39  ;;  %v1070_v49 = vsub.f32 %v48_v15, %v1041_v25  ;;  %v37_v35 = vld [vmem:[%s1331_s3 + $0x18] sm:$0xff] }
  0x21   :  { %103 = vmatmul.f32.gmra.mxu0 %v102_v13  ;;  %179 = vmatmul.f32.vlgmr.msra.gmra.mxu1 %v964_v50  ;;  %v436_v57 = vand.u32 4294901760, %v1073_v51  ;;  %v1236_v38 = vand.u32 4294901760, %v37_v35 }
  0x22   :  { %300 = vmatpush.msrb.mxu0 %v138_v31  ;;  %340 = vmatpush.msrb.mxu1 %v845_v2  ;;  %v1080_v23 = vsub.f32 %v45_v39, %v1056_v26  ;;  %v42_v2 = vld [vmem:[%s1331_s3 + $0x40] sm:$0xff]  ;;  %v424_v31 = vand.u32 4294901760, %v1067_v48  ;;  %v430_v55 = vand.u32 4294901760, %v1070_v49  ;;  %v36_v39 = vld [vmem:[%s1331_s3 + $0x10] sm:$0xff] }
  0x23   :  { %v437_v63 = vsub.f32 %v1073_v51, %v436_v57  ;;  %376 = vmatpush.msrb.mxu2 %v1041_v25 }
  0x24   :  { %304 = vmatpush.msrb.mxu0 %v144_v40  ;;  %342 = vmatpush.msrb.mxu1 %v847_v3  ;;  %v425_v3 = vsub.f32 %v1067_v48, %v424_v31  ;;  %v431_v28 = vsub.f32 %v1070_v49, %v430_v55  ;;  %v1107_v40 = vand.u32 4294901760, %v42_v2  ;;  %v448_v33 = vand.u32 4294901760, %v1080_v23 }
  0x25   :  { %232 = vmatmul.f32.gmra.mxu2 %v996_v1  ;;  %272 = vmatmul.f32.gmra.mxu3 %v100_v24  ;;  %v438_v41 = vand.u32 4294901760, %v437_v63  ;;  %v38_v24 = vld [vmem:[%s1331_s3 + $0x20] sm:$0xff]  ;;  %v35_v63 = vld [vmem:[%s1331_s3 + $0x8] sm:$0xff] }
  0x26   :  { %308 = vmatpush.msrb.mxu0 %v150_v46  ;;  %344 = vmatpush.msrb.mxu1 %v858_v7  ;;  %v426_v7 = vand.u32 4294901760, %v425_v3  ;;  %v1118_v46 = vsub.f32 %v43_v45, %v1091_v58  ;;  %v432_v1 = vand.u32 4294901760, %v431_v28  ;;  %v1219_v34 = vand.u32 4294901760, %v38_v24 }
  0x27   :  { %378 = vmatpush.msrb.mxu2 %v1043_v37  ;;  %v1246_v3 = vand.u32 4294901760, %v36_v39  ;;  %v1250_v28 = vsub.f32 %v37_v35, %v1236_v38 }
  0x28   :  { %312 = vmatpush.msrb.mxu0 %v156_v52  ;;  %346 = vmatpush.msrb.mxu1 %v860_v8  ;;  %v1129_v8 = vsub.f32 %v42_v2, %v1107_v40  ;;  %v449_v52 = vsub.f32 %v1080_v23, %v448_v33  ;;  %v460_v47 = vand.u32 4294901760, %v1118_v46  ;;  %v1232_v21 = vsub.f32 %v38_v24, %v1219_v34 }
  0x29   :  { %183 = vmatmul.f32.gmra.mxu1 %v978_v56  ;;  %427 = vmatpush.msrb.mxu3 %v426_v7 }
  0x2a   :  { %316 = vmatpush.msrb.mxu0 %v162_v59  ;;  %348 = vmatpush.msrb.mxu1 %v862_v9  ;;  %v444_v9 = vand.u32 4294901760, %v443_v4  ;;  %v455_v59 = vsub.f32 %v1096_v62, %v454_v5  ;;  %v466_v53 = vand.u32 4294901760, %v1129_v8  ;;  %v490_v2 = vand.u32 4294901760, %v1232_v21 }
  0x2b   :  { %433 = vmatpush.msrb.mxu3 %v432_v1  ;;  %380 = vmatpush.msrb.mxu2 %v1054_v19  ;;  %v501_v4 = vsub.f32 %v36_v39, %v1246_v3 }
  0x2c   :  { %320 = vmatpush.msrb.mxu0 %v168_v0  ;;  %350 = vmatpush.msrb.mxu1 %v877_v14  ;;  %v450_v14 = vand.u32 4294901760, %v449_v52  ;;  %v461_v0 = vsub.f32 %v1118_v46, %v460_v47  ;;  %v456_v6 = vand.u32 4294901760, %v455_v59  ;;  %v491_v1 = vsub.f32 %v1232_v21, %v490_v2 }
  0x2d   :  { %439 = vmatpush.msrb.mxu3 %v438_v41  ;;  %382 = vmatpush.msrb.mxu2 %v1056_v26  ;;  %v1261_v41 = vand.u32 4294901760, %v35_v63  ;;  %v496_v52 = vand.u32 4294901760, %v1250_v28 }
  0x2e   :  { %324 = vmatpush.msrb.mxu0 %v174_v10  ;;  %352 = vmatpush.msrb.mxu1 %v883_v16  ;;  %v467_v16 = vsub.f32 %v1129_v8, %v466_v53  ;;  %v39_v10 = vld [vmem:[%s1331_s3 + $0x28] sm:$0xff]  ;;  %v492_v59 = vand.u32 4294901760, %v491_v1 }
  0x2f   :  { %326 = vmatmul.f32.vlgmr.msrb.gmra.mxu0 %v964_v50  ;;  %445 = vmatpush.msrb.mxu3 %v444_v9  ;;  %v1204_v17 = vand.u32 4294901760, %v39_v10  ;;  %v34_v9 = vld [vmem:[%s1331_s3] sm:$0xff] }
  0x30   :  { %354 = vmatpush.msrb.mxu1 %v898_v22  ;;  %529 = vmatpush.msra.mxu0 %v1067_v48  ;;  %v462_v22 = vand.u32 4294901760, %v461_v0  ;;  %v507_v0 = vsub.f32 %v35_v63, %v1261_v41 }
  0x31   :  { %451 = vmatpush.msrb.mxu3 %v450_v14  ;;  %384 = vmatpush.msrb.mxu2 %v1058_v44  ;;  %v1217_v32 = vsub.f32 %v39_v10, %v1204_v17  ;;  %v502_v14 = vand.u32 4294901760, %v501_v4 }
  0x32   :  { %356 = vmatpush.msrb.mxu1 %v909_v27  ;;  %532 = vmatpush.msra.mxu0 %v1070_v49  ;;  %v468_v27 = vand.u32 4294901760, %v467_v16  ;;  %v497_v16 = vsub.f32 %v1250_v28, %v496_v52 }
  0x33   :  { %457 = vmatpush.msrb.mxu3 %v456_v6  ;;  %386 = vmatpush.msrb.mxu2 %v1091_v58  ;;  %v484_v15 = vand.u32 4294901760, %v1217_v32  ;;  %v1270_v6 = vand.u32 4294901760, %v34_v9 }
  0x34   :  { %358 = vmatpush.msrb.mxu1 %v936_v36  ;;  %535 = vmatpush.msra.mxu0 %v1073_v51  ;;  %v41_v36 = vld [vmem:[%s1331_s3 + $0x38] sm:$0xff] }
  0x35   :  { %463 = vmatpush.msrb.mxu3 %v462_v22  ;;  %388 = vmatpush.msrb.mxu2 %v1107_v40  ;;  %v485_v45 = vsub.f32 %v1217_v32, %v484_v15  ;;  %v503_v22 = vsub.f32 %v501_v4, %v502_v14 }
  0x36   :  { %360 = vmatpush.msrb.mxu1 %v951_v43  ;;  %538 = vmatpush.msra.mxu0 %v1077_v54  ;;  %v1185_v43 = vand.u32 4294901760, %v41_v36 }
  0x37   :  { %330 = vmatmul.f32.gmra.mxu0 %v978_v56  ;;  %362 = vmatmul.f32.vlgmr.msrb.gmra.mxu1 %v964_v50  ;;  %v40_v50 = vld [vmem:[%s1331_s3 + $0x30] sm:$0xff]  ;;  %v486_v7 = vand.u32 4294901760, %v485_v45  ;;  %v504_v10 = vand.u32 4294901760, %v503_v22  ;;  %v372_v45 = vstv %s1332_s4 }
  0x38   :  { %587 = vmatpush.msra.mxu1 %v1039_v18  ;;  %469 = vmatpush.msrb.mxu3 %v468_v27  ;;  %v1193_v60 = vand.u32 4294901760, %v40_v50  ;;  %v508_v27 = vand.u32 4294901760, %v507_v0 }
  0x39   :  { %541 = vmatpush.msra.mxu0 %v1080_v23  ;;  %390 = vmatpush.msrb.mxu2 %v1185_v43 }
  0x3a   :  { %589 = vmatpush.msra.mxu1 %v1041_v25  ;;  %v1202_v12 = vsub.f32 %v40_v50, %v1193_v60  ;;  %v498_v50 = vand.u32 4294901760, %v497_v16  ;;  %v509_v24 = vsub.f32 %v507_v0, %v508_v27 }
  0x3b   :  { %544 = vmatpush.msra.mxu0 %v1096_v62  ;;  %392 = vmatpush.msrb.mxu2 %v1193_v60 }
  0x3c   :  { %591 = vmatpush.msra.mxu1 %v1043_v37  ;;  %v478_v30 = vand.u32 4294901760, %v1202_v12  ;;  %v510_v35 = vand.u32 4294901760, %v509_v24 }
  0x3d   :  { %547 = vmatpush.msra.mxu0 %v1118_v46  ;;  %394 = vmatpush.msrb.mxu2 %v1204_v17 }
  0x3e   :  { %593 = vmatpush.msra.mxu1 %v1054_v19  ;;  %v479_v20 = vsub.f32 %v1202_v12, %v478_v30 }
  0x3f   :  { %366 = vmatmul.f32.gmra.mxu1 %v978_v56  ;;  %550 = vmatpush.msra.mxu0 %v1129_v8  ;;  %v1191_v56 = vsub.f32 %v41_v36, %v1185_v43  ;;  %v513_v36 = vsub.f32 %v34_v9, %v1270_v6 }
  0x40   :  { %595 = vmatpush.msra.mxu1 %v1056_v26  ;;  %396 = vmatpush.msrb.mxu2 %v1219_v34  ;;  %v480_v42 = vand.u32 4294901760, %v479_v20 }
  0x41   :  { %v472_v11 = vand.u32 4294901760, %v1191_v56  ;;  %553 = vmatpush.msra.mxu0 %v1191_v56 }
  0x42   :  { %597 = vmatpush.msra.mxu1 %v1058_v44  ;;  %398 = vmatpush.msrb.mxu2 %v1236_v38 }
  0x43   :  { %v473_v29 = vsub.f32 %v1191_v56, %v472_v11  ;;  %556 = vmatpush.msra.mxu0 %v1202_v12 }
  0x44   :  { %599 = vmatpush.msra.mxu1 %v1091_v58  ;;  %400 = vmatpush.msrb.mxu2 %v1246_v3 }
  0x45   :  { %v474_v13 = vand.u32 4294901760, %v473_v29  ;;  %559 = vmatpush.msra.mxu0 %v1217_v32  ;;  %v514_v29 = vand.u32 4294901760, %v513_v36 }
  0x46   :  { %601 = vmatpush.msra.mxu1 %v1107_v40  ;;  %402 = vmatpush.msrb.mxu2 %v1261_v41 }
  0x47   :  { %475 = vmatpush.msrb.mxu3 %v474_v13  ;;  %562 = vmatpush.msra.mxu0 %v1232_v21  ;;  %v515_v13 = vsub.f32 %v513_v36, %v514_v29 }
  0x48   :  { %603 = vmatpush.msra.mxu1 %v1185_v43  ;;  %404 = vmatpush.msrb.mxu2 %v1270_v6 }
  0x49   :  { %481 = vmatpush.msrb.mxu3 %v480_v42  ;;  %565 = vmatpush.msra.mxu0 %v1250_v28  ;;  %v516_v20 = vand.u32 4294901760, %v515_v13 }
  0x4a   :  { %605 = vmatpush.msra.mxu1 %v1193_v60  ;;  %634 = vmatpush.msra.mxu2 %v424_v31 }
  0x4b   :  { %487 = vmatpush.msrb.mxu3 %v486_v7  ;;  %568 = vmatpush.msra.mxu0 %v501_v4 }
  0x4c   :  { %607 = vmatpush.msra.mxu1 %v1204_v17  ;;  %638 = vmatpush.msra.mxu2 %v430_v55 }
  0x4d   :  { %493 = vmatpush.msrb.mxu3 %v492_v59  ;;  %571 = vmatpush.msra.mxu0 %v507_v0 }
  0x4e   :  { %609 = vmatpush.msra.mxu1 %v1219_v34  ;;  %642 = vmatpush.msra.mxu2 %v436_v57 }
  0x4f   :  { %499 = vmatpush.msrb.mxu3 %v498_v50  ;;  %574 = vmatpush.msra.mxu0 %v513_v36 }
  0x50   :  { %611 = vmatpush.msra.mxu1 %v1236_v38  ;;  %646 = vmatpush.msra.mxu2 %v442_v61 }
  0x51   :  { %505 = vmatpush.msrb.mxu3 %v504_v10 }
  0x52   :  { %613 = vmatpush.msra.mxu1 %v1246_v3  ;;  %650 = vmatpush.msra.mxu2 %v448_v33 }
  0x53   :  { %511 = vmatpush.msrb.mxu3 %v510_v35 }
  0x54   :  { %615 = vmatpush.msra.mxu1 %v1261_v41  ;;  %654 = vmatpush.msra.mxu2 %v454_v5 }
  0x55   :  { %517 = vmatpush.msrb.mxu3 %v516_v20 }
  0x56   :  { %617 = vmatpush.msra.mxu1 %v1270_v6  ;;  %658 = vmatpush.msra.mxu2 %v460_v47 }
  0x57   :  { %705 = vmatpush.msra.mxu3 %v1039_v18 }
  0x58   :  { %662 = vmatpush.msra.mxu2 %v466_v53 }
  0x59   :  { %707 = vmatpush.msra.mxu3 %v1041_v25 }
  0x5a   :  { %666 = vmatpush.msra.mxu2 %v472_v11 }
  0x5b   :  { %709 = vmatpush.msra.mxu3 %v1043_v37  ;;  %v775_v37 = vld [vmem:[%s1330_s2] ss:$0 sm:$0xff] }
  0x5c   :  { %670 = vmatpush.msra.mxu2 %v478_v30 }
  0x5d   :  { %711 = vmatpush.msra.mxu3 %v1054_v19 }
  0x5e   :  { %674 = vmatpush.msra.mxu2 %v484_v15 }
  0x5f   :  { %713 = vmatpush.msra.mxu3 %v1056_v26 }
  0x60   :  { %678 = vmatpush.msra.mxu2 %v490_v2 }
  0x61   :  { %715 = vmatpush.msra.mxu3 %v1058_v44 }
  0x62   :  { %682 = vmatpush.msra.mxu2 %v496_v52 }
  0x63   :  { %717 = vmatpush.msra.mxu3 %v1091_v58 }
  0x64   :  { %686 = vmatpush.msra.mxu2 %v502_v14 }
  0x65   :  { %719 = vmatpush.msra.mxu3 %v1107_v40 }
  0x66   :  { %690 = vmatpush.msra.mxu2 %v508_v27 }
  0x67   :  { %721 = vmatpush.msra.mxu3 %v1185_v43 }
  0x68   :  { %694 = vmatpush.msra.mxu2 %v514_v29 }
  0x69   :  { %723 = vmatpush.msra.mxu3 %v1193_v60 }
  0x6b   :  { %725 = vmatpush.msra.mxu3 %v1204_v17 }
  0x6d   :  { %727 = vmatpush.msra.mxu3 %v1219_v34 }
  0x6f   :  { %729 = vmatpush.msra.mxu3 %v1236_v38 }
  0x71   :  { %731 = vmatpush.msra.mxu3 %v1246_v3 }
  0x73   :  { %733 = vmatpush.msra.mxu3 %v1261_v41 }
  0x75   :  { %735 = vmatpush.msra.mxu3 %v1270_v6 }
  0x96   :  { %v96_v18 = vpop.f32.mrf.mxu0 }
  0x97   :  { %v97_v26 = vadd.f32 %v775_v37, %v96_v18 }
  0x9e   :  { %v180_v25 = vpop.f32.mrf.mxu1  ;;  %v104_v19 = vpop.f32.mrf.mxu0 }
  0x9f   :  { %v181_v48 = vadd.f32 %v180_v25, %v97_v26  ;;  %v105_v54 = vadd.f32 %v775_v37, %v104_v19 }
  0xa0   :  { %v228_v44 = vpop.f32.mrf.mxu2  ;;  %v267_v51 = vpop.f32.mrf.mxu3 }
  0xa1   :  { %v229_v23 = vadd.f32 %v228_v44, %v181_v48 }
  0xa3   :  { %v268_v55 = vadd.f32 %v267_v51, %v229_v23 }
  0xa6   :  { %v184_v49 = vpop.f32.mrf.mxu1 }
  0xa7   :  { %v185_v57 = vadd.f32 %v184_v49, %v105_v54 }
  0xa8   :  { %v233_v58 = vpop.f32.mrf.mxu2  ;;  %v273_v46 = vpop.f32.mrf.mxu3 }
  0xa9   :  { %v234_v40 = vadd.f32 %v233_v58, %v185_v57 }
  0xab   :  { %v274_v47 = vadd.f32 %v273_v46, %v234_v40 }
  0xac   :  { %v327_v31 = vpop.f32.mrf.mxu0 }
  0xad   :  { %v328_v61 = vadd.f32 %v327_v31, %v268_v55 }
  0xb4   :  { %v363_v62 = vpop.f32.mrf.mxu1  ;;  %v331_v8 = vpop.f32.mrf.mxu0 }
  0xb5   :  { %v364_v33 = vadd.f32 %v363_v62, %v328_v61  ;;  %v332_v43 = vadd.f32 %v331_v8, %v274_v47 }
  0xb7   :  { %v370_v5 = vmax.f32 %v364_v33, 0.0 }
  0xb9   :  { %v405_v53 = vand.u32 4294901760, %v370_v5 }
  0xbb   :  { %v406_v56 = vsub.f32 %v370_v5, %v405_v53  ;;  %519 = vmatmul.f32.vlgmr.msrb.gmra.mxu3 %v405_v53 }
  0xbc   :  { %v367_v60 = vpop.f32.mrf.mxu1 }
  0xbd   :  { %v368_v11 = vadd.f32 %v367_v60, %v332_v43  ;;  %577 = vmatmul.f32.vlgmr.msra.gmra.mxu0 %v406_v56  ;;  %v407_v12 = vand.u32 4294901760, %v406_v56 }
  0xbf   :  { %v371_v17 = vmax.f32 %v368_v11, 0.0  ;;  %621 = vmatmul.f32.vlgmr.msra.gmra.mxu1 %v407_v12  ;;  %v408_v30 = vsub.f32 %v406_v56, %v407_v12 }
  0xc1   :  { %v413_v32 = vand.u32 4294901760, %v371_v17  ;;  %v409_v34 = vand.u32 4294901760, %v408_v30 }
  0xc3   :  { %v414_v15 = vsub.f32 %v371_v17, %v413_v32  ;;  %410 = vmatmul.f32.vlgmr.msrb.gmra.mxu2 %v409_v34  ;;  %523 = vmatmul.f32.gmra.mxu3 %v413_v32 }
  0xc5   :  { %582 = vmatmul.f32.gmra.mxu0 %v414_v15  ;;  %v415_v21 = vand.u32 4294901760, %v414_v15 }
  0xc7   :  { %627 = vmatmul.f32.gmra.mxu1 %v415_v21  ;;  %v416_v38 = vsub.f32 %v414_v15, %v415_v21 }
  0xc9   :  { %v417_v39 = vand.u32 4294901760, %v416_v38 }
  0xcb   :  { %418 = vmatmul.f32.gmra.mxu2 %v417_v39  ;;  %737 = vmatmul.f32.vlgmr.msra.gmra.mxu3 %v405_v53 }
  0xd3   :  { %696 = vmatmul.f32.vlgmr.msra.gmra.mxu2 %v405_v53  ;;  %741 = vmatmul.f32.gmra.mxu3 %v413_v32 }
  0xdb   :  { %700 = vmatmul.f32.gmra.mxu2 %v413_v32 }
 0x13a   :  { %v578_v7 = vpop.f32.mrf.mxu0 }
 0x13c   :  { %v622_v52 = vpop.f32.mrf.mxu1 }
 0x13e   :  { %v520_v42 = vpop.f32.mrf.mxu3 }
 0x142   :  { %v583_v16 = vpop.f32.mrf.mxu0 }
 0x144   :  { %v628_v36 = vpop.f32.mrf.mxu1 }
 0x146   :  { %v411_v2 = vpop.f32.mrf.mxu2  ;;  %v524_v28 = vpop.f32.mrf.mxu3 }
 0x147   :  { %v412_v3 = vadd.f32 %v411_v2, %v372_v45 }
 0x149   :  { %v521_v63 = vadd.f32 %v520_v42, %v412_v3 }
 0x14b   :  { %v579_v41 = vadd.f32 %v578_v7, %v521_v63 }
 0x14d   :  { %v623_v59 = vadd.f32 %v622_v52, %v579_v41 }
 0x14e   :  { %v419_v1 = vpop.f32.mrf.mxu2  ;;  %v738_v14 = vpop.f32.mrf.mxu3 }
 0x14f   :  { %v420_v4 = vadd.f32 %v419_v1, %v372_v45 }
 0x151   :  { %v525_v9 = vadd.f32 %v524_v28, %v420_v4 }
 0x153   :  { %v584_v27 = vadd.f32 %v583_v16, %v525_v9 }
 0x155   :  { %v629_v50 = vadd.f32 %v628_v36, %v584_v27 }
 0x156   :  { %v697_v0 = vpop.f32.mrf.mxu2  ;;  %v742_v29 = vpop.f32.mrf.mxu3 }
 0x157   :  { %v698_v6 = vadd.f32 %v697_v0, %v623_v59 }
 0x159   :  { %v739_v22 = vadd.f32 %v738_v14, %v698_v6 }
 0x15b   :  { %776 = vtanh.f32 %v739_v22 }
 0x15e   :  { %v701_v10 = vpop.f32.mrf.mxu2 }
 0x15f   :  { %v702_v24 = vadd.f32 %v701_v10, %v629_v50 }
 0x161   :  { %v777_v35 = vpop.eup %776  ;;  %v743_v13 = vadd.f32 %v742_v29, %v702_v24 }
 0x162   :  { %v747_v20 = vmul.f32 0.5, %v777_v35 }
 0x163   :  { %778 = vtanh.f32 %v743_v13 }
 0x164   :  { %v749_v18 = vadd.f32 0.5, %v747_v20 }
 0x166   :  { %752 = vst.msk [vmem:[#allocation3] sm:$0xff] %vm751_vm1, %v749_v18 }
 0x169   :  { %v779_v25 = vpop.eup %778 }
 0x16a   :  { %v748_v37 = vmul.f32 0.5, %v779_v25 }
 0x16c   :  { %v750_v19 = vadd.f32 0.5, %v748_v37 }
 0x16e   :  { %753 = vst.msk [vmem:[#allocation3 + $0x8] sm:$0xff] %vm751_vm1, %v750_v19 }
 0x16f   :  { %757 = vsyncadd [#allocation4], 240  ;;  %s760_s25 = sshll.u32 %s1333_s5, 4  ;;  %s806_s26 = smov [#allocation3]   ;;  %s761_s25 = int_to_ptr.hbm [resolvable:$true] %s760_s25 }
 0x170   :  { %s758_s27 = sshll.u32 %s806_s26, 4  ;;  %s807_s28 = smov 16   ;;  %s759_s27 = int_to_ptr.vmem [resolvable:$true] %s758_s27 }
 0x171   :  { %s808_s29 = smov 1  }
 0x172   :  { %766 = dma.vmem_to_hbm [thread:$0]  %s759_s27, 16, %s761_s25, [#allocation4], %s807_s28, %s807_s28, %s808_s29  }
 0x173   :  { %804 = dma.done.wait [#allocation4], 256  }
 0x174   :  { %805 = vsyncadd [#allocation4], 4294967040 }
 0x175   :  { %771 = vsyncpa [#allocation4], 1 }

</bundles_post_ra>
